<compile_context>
chip_gen: v7x
topology: tpu7x:2x2x1
jax: 0.10.0
libtpu: 0.0.40
codegen_flags: <defaults>
</compile_context>

<pallas_src>
import math
from functools import partial

import jax
import jax.numpy as jnp
from jax.experimental import pallas as pl
from jax.experimental.pallas import tpu as pltpu


def _conv_gelu_res_ln(win, cur, w, bias_f32, *, tT, K, C, out_dtype):
    """conv (as matmul) + bias + exact GELU + residual + no-affine LayerNorm."""
    if C % 128 == 0 and K > 1:
        # im2col-lite: single MXU matmul, K taps folded into the contraction
        # dim (depth K*C keeps the 128/256-wide MXU fed; one push/pop cadence).
        lhs = jnp.concatenate([win[k:k + tT, :] for k in range(K)], axis=-1)
        acc = jnp.dot(lhs, w, preferred_element_type=jnp.float32)
    else:
        # lane-sparse C (< 128): K accumulated shifted matmuls.
        acc = jnp.dot(win[0:tT, :], w[0:C, :], preferred_element_type=jnp.float32)
        for k in range(1, K):
            acc = acc + jnp.dot(win[k:k + tT, :], w[k * C:(k + 1) * C, :],
                                preferred_element_type=jnp.float32)
    acc = acc + bias_f32

    # exact GELU (erf), matching torch.nn.GELU default
    g = 0.5 * acc * (1.0 + jax.lax.erf(acc * (1.0 / math.sqrt(2.0))))

    # residual add + LayerNorm over C (no affine, eps=1e-5), one-pass stats
    y = cur.astype(jnp.float32) + g
    m = jnp.mean(y, axis=-1, keepdims=True)
    var = jnp.mean(y * y, axis=-1, keepdims=True) - m * m
    return ((y - m) * jax.lax.rsqrt(var + 1e-5)).astype(out_dtype)


def _kernel_simple(x_tile_ref, w_ref, b_ref, o_ref, *, tT, K, PAD, C):
    """Single T-tile per batch (nT == 1) or K == 1: zero-pad in registers."""
    cur = x_tile_ref[0]                                   # (tT, C), native dtype
    if PAD > 0:
        z = jnp.zeros((PAD, C), cur.dtype)
        win = jnp.concatenate([z, cur, z], axis=0)        # (tT + 2*PAD, C)
    else:
        win = cur
    o_ref[0] = _conv_gelu_res_ln(win, cur, w_ref[...],
                                 b_ref[0].astype(jnp.float32),
                                 tT=tT, K=K, C=C, out_dtype=o_ref.dtype)


def _kernel_halo(x_tile_ref, x_hbm, w_ref, b_ref, o_ref,
                 top_ref, bot_ref, dma_sem, *, tT, K, PAD, C):
    """Tiled T with halo rows DMA'd from the HBM-resident input."""
    b = pl.program_id(0)
    t = pl.program_id(1)
    nT = pl.num_programs(1)

    # Kick off both halo DMAs first, on independent semaphores, so they run
    # concurrently and overlap the weight / tile loads below.
    @pl.when(t > 0)
    def _():
        pltpu.make_async_copy(
            x_hbm.at[b, pl.ds(t * tT - PAD, PAD), :], top_ref, dma_sem.at[0]).start()

    @pl.when(t == 0)
    def _():
        top_ref[...] = jnp.zeros(top_ref.shape, top_ref.dtype)

    @pl.when(t < nT - 1)
    def _():
        pltpu.make_async_copy(
            x_hbm.at[b, pl.ds((t + 1) * tT, PAD), :], bot_ref, dma_sem.at[1]).start()

    @pl.when(t == nT - 1)
    def _():
        bot_ref[...] = jnp.zeros(bot_ref.shape, bot_ref.dtype)

    cur = x_tile_ref[0]                                   # (tT, C), native dtype
    w = w_ref[...]                                        # (K*C, C)
    bias = b_ref[0].astype(jnp.float32)

    @pl.when(t > 0)
    def _():
        pltpu.make_async_copy(
            x_hbm.at[b, pl.ds(t * tT - PAD, PAD), :], top_ref, dma_sem.at[0]).wait()

    @pl.when(t < nT - 1)
    def _():
        pltpu.make_async_copy(
            x_hbm.at[b, pl.ds((t + 1) * tT, PAD), :], bot_ref, dma_sem.at[1]).wait()

    # Register-level window assembly (no VMEM scratch round-trip for `cur`).
    win = jnp.concatenate([top_ref[...], cur, bot_ref[...]], axis=0)
    o_ref[0] = _conv_gelu_res_ln(win, cur, w, bias,
                                 tT=tT, K=K, C=C, out_dtype=o_ref.dtype)


def _choose_tile_t(T, pad, target=512):
    """Largest T-tile that divides T, is a multiple of 8 and >= pad."""
    if T <= target:
        return T
    start = target - (target % 8)
    for tt in range(start, 7, -8):
        if T % tt == 0 and tt >= pad:
            return tt
    return T  # fall back: whole sequence (always a legal full-dim block)


def conv_positional_encoding(x, weight, bias, kernel_size, groups, *,
                             tile_t_target=512):
    """x: (B, T, C); weight: (C, C//groups, K) [PyTorch layout]; bias: (C,)."""
    B, T, C = x.shape
    K = kernel_size
    PAD = K // 2
    assert K % 2 == 1, "residual x + conv(x) requires an odd kernel_size"
    assert C % groups == 0
    cpg = C // groups

    # Dense block-diagonal per-tap weights, rows ordered (k, c_in) to match the
    # im2col LHS column order.  PyTorch conv weight is [c_out, c_in_rel, k].
    w_full = jnp.zeros((K, C, C), x.dtype)
    for g in range(groups):
        blk = jnp.transpose(weight[g * cpg:(g + 1) * cpg], (2, 1, 0)).astype(x.dtype)
        w_full = w_full.at[:, g * cpg:(g + 1) * cpg, g * cpg:(g + 1) * cpg].set(blk)
    w_mat = w_full.reshape(K * C, C)
    b2d = bias.reshape(1, C).astype(jnp.float32)

    tT = _choose_tile_t(T, PAD, tile_t_target)
    nT = T // tT
    itm = x.dtype.itemsize
    need_halo = (PAD > 0) and (nT > 1)

    # VMEM budget: double-buffered in/out tiles + resident weights/bias +
    # window / im2col LHS / f32 epilogue temps + halo scratches.
    est = (4 * tT * C * itm
           + 2 * (K * C * C * itm + 4 * C)
           + (tT + 2 * PAD) * C * itm
           + tT * K * C * itm
           + 2 * PAD * C * itm
           + 6 * tT * C * 4)
    vmem_limit = int(min(max(3 * est, 32 * 1024 * 1024), 64 * 1024 * 1024))

    cost = pl.CostEstimate(
        flops=2 * B * T * K * C * C + 12 * B * T * C,
        transcendentals=B * T * C,
        bytes_accessed=2 * B * T * C * itm + K * C * C * itm + 4 * C)

    tile_spec = pl.BlockSpec((1, tT, C), lambda b, t: (b, t, 0))
    w_spec = pl.BlockSpec((K * C, C), lambda b, t: (0, 0))       # resident
    bias_spec = pl.BlockSpec((1, C), lambda b, t: (0, 0))
    out_spec = pl.BlockSpec((1, tT, C), lambda b, t: (b, t, 0))

    if need_halo:
        kernel = partial(_kernel_halo, tT=tT, K=K, PAD=PAD, C=C)
        in_specs = [tile_spec,
                    pl.BlockSpec(memory_space=pl.ANY),           # x in HBM (halo DMA)
                    w_spec, bias_spec]
        scratch = [pltpu.VMEM((PAD, C), x.dtype),                # top halo
                   pltpu.VMEM((PAD, C), x.dtype),                # bottom halo
                   pltpu.SemaphoreType.DMA((2,))]
        args = (x, x, w_mat, b2d)
    else:
        kernel = partial(_kernel_simple, tT=tT, K=K, PAD=PAD, C=C)
        in_specs = [tile_spec, w_spec, bias_spec]
        scratch = []
        args = (x, w_mat, b2d)

    return pl.pallas_call(
        kernel,
        out_shape=jax.ShapeDtypeStruct((B, T, C), x.dtype),
        grid_spec=pltpu.PrefetchScalarGridSpec(
            num_scalar_prefetch=0,
            grid=(B, nT),
            in_specs=in_specs,
            out_specs=out_spec,
            scratch_shapes=scratch),
        compiler_params=pltpu.CompilerParams(
            dimension_semantics=("parallel", "parallel"),
            vmem_limit_bytes=vmem_limit),
        cost_estimate=cost,
    )(*args)


def reference(x, weight, bias, kernel_size, groups):
    """Plain-JAX re-implementation of the PyTorch forward, for verification."""
    xc = jnp.transpose(x, (0, 2, 1))                       # (B, C, T)
    pad = kernel_size // 2
    conv = jax.lax.conv_general_dilated(
        xc, weight, window_strides=(1,), padding=[(pad, pad)],
        dimension_numbers=("NCH", "OIH", "NCH"),
        feature_group_count=groups)
    conv = conv + bias[None, :, None]
    conv = 0.5 * conv * (1.0 + jax.lax.erf(conv / jnp.sqrt(2.0)))   # exact GELU
    y = xc + conv
    y = jnp.transpose(y, (0, 2, 1))                        # back to (B, T, C)
    mean = jnp.mean(y, axis=-1, keepdims=True)
    var = jnp.mean(jnp.square(y - mean), axis=-1, keepdims=True)
    return (y - mean) / jnp.sqrt(var + 1e-5)


if __name__ == "__main__":
    def run_case(B, T, C, K, G, tile_t_target=512):
        key = jax.random.PRNGKey(0)
        kx, kw, kb = jax.random.split(key, 3)
        x = jax.random.normal(kx, (B, T, C), jnp.float32)
        fan_in = (C // G) * K
        bound = 1.0 / math.sqrt(fan_in)
        weight = jax.random.uniform(kw, (C, C // G, K), jnp.float32, -bound, bound)
        bias = jax.random.uniform(kb, (C,), jnp.float32, -bound, bound)

        out = conv_positional_encoding(x, weight, bias, K, G,
                                       tile_t_target=tile_t_target)
        jax.block_until_ready(out)
        ref = reference(x, weight, bias, K, G)
        assert out.shape == (B, T, C)
        assert jnp.allclose(out, ref, atol=1e-4, rtol=1e-4), \
            f"Pallas kernel mismatch vs reference (B={B}, T={T}, C={C}, K={K}, G={G})"

    # toy module shape (lane-sparse C, single T tile -> DMA-free kernel path)
    run_case(B=2, T=16, C=32, K=5, G=4)
    # lane-dense C and multi-tile T -> halo-DMA kernel + im2col single matmul
    run_case(B=2, T=64, C=128, K=5, G=4, tile_t_target=16)
    # lane-sparse C with multi-tile T -> halo-DMA kernel + accumulated matmuls
    run_case(B=2, T=64, C=32, K=5, G=4, tile_t_target=16)

    print("KERNEL_OK")
</pallas_src>

<mosaic_0001>
module attributes {stable_mosaic.version = 11 : i64} {
  func.func @_kernel_simple(%arg0: i32, %arg1: i32, %arg2: memref<1x16x32xf32, #tpu.memory_space<vmem>>, %arg3: memref<160x32xf32, #tpu.memory_space<vmem>>, %arg4: memref<1x32xf32, #tpu.memory_space<vmem>>, %arg5: memref<1x16x32xf32, #tpu.memory_space<vmem>>) attributes {dimension_semantics = [#tpu.dimension_semantics<parallel>, #tpu.dimension_semantics<parallel>], iteration_bounds = array<i64: 2, 1>, scalar_prefetch = 0 : i64, scratch_operands = 0 : i64, tpu.core_type = #tpu.core_type<tc>, window_params = [{transform_indices = @transform_0, window_bounds = array<i64: 1, 16, 32>}, {pipeline_mode = #tpu.pipeline_mode<synchronous>, transform_indices = @transform_1, window_bounds = array<i64: 160, 32>}, {pipeline_mode = #tpu.pipeline_mode<synchronous>, transform_indices = @transform_2, window_bounds = array<i64: 1, 32>}, {transform_indices = @transform_3, window_bounds = array<i64: 1, 16, 32>}]} {
    %c0 = arith.constant 0 : index
    %c0_0 = arith.constant 0 : index
    %c0_1 = arith.constant 0 : index
    %0 = vector.load %arg2[%c0, %c0_0, %c0_1] : memref<1x16x32xf32, #tpu.memory_space<vmem>>, vector<1x16x32xf32>
    %1 = vector.shape_cast %0 : vector<1x16x32xf32> to vector<16x32xf32>
    %cst = arith.constant 0.000000e+00 : f32
    %2 = vector.broadcast %cst : f32 to vector<2x32xf32>
    %3 = tpu.concatenate %2, %1, %2 in 0 : vector<2x32xf32>, vector<16x32xf32>, vector<2x32xf32> -> vector<20x32xf32>
    %c0_2 = arith.constant 0 : index
    %c0_3 = arith.constant 0 : index
    %4 = vector.load %arg3[%c0_2, %c0_3] : memref<160x32xf32, #tpu.memory_space<vmem>>, vector<160x32xf32>
    %c0_4 = arith.constant 0 : index
    %c0_5 = arith.constant 0 : index
    %5 = vector.load %arg4[%c0_4, %c0_5] : memref<1x32xf32, #tpu.memory_space<vmem>>, vector<1x32xf32>
    %6 = vector.shape_cast %5 : vector<1x32xf32> to vector<32xf32>
    %7 = vector.extract_strided_slice %3 {offsets = [0, 0], sizes = [16, 32], strides = [1, 1]} : vector<20x32xf32> to vector<16x32xf32>
    %8 = vector.extract_strided_slice %4 {offsets = [0, 0], sizes = [32, 32], strides = [1, 1]} : vector<160x32xf32> to vector<32x32xf32>
    %cst_6 = arith.constant dense<0.000000e+00> : vector<16x32xf32>
    %9 = tpu.matmul %7, %8, %cst_6 {dimension_numbers = #tpu.dot_dimension_numbers<[1], [0], [0], [1], [0, 0, 1, 1], [], []>} : vector<16x32xf32>, vector<32x32xf32>, vector<16x32xf32> -> vector<16x32xf32>
    %10 = vector.extract_strided_slice %3 {offsets = [1, 0], sizes = [16, 32], strides = [1, 1]} : vector<20x32xf32> to vector<16x32xf32>
    %11 = vector.extract_strided_slice %4 {offsets = [32, 0], sizes = [32, 32], strides = [1, 1]} : vector<160x32xf32> to vector<32x32xf32>
    %cst_7 = arith.constant dense<0.000000e+00> : vector<16x32xf32>
    %12 = tpu.matmul %10, %11, %cst_7 {dimension_numbers = #tpu.dot_dimension_numbers<[1], [0], [0], [1], [0, 0, 1, 1], [], []>} : vector<16x32xf32>, vector<32x32xf32>, vector<16x32xf32> -> vector<16x32xf32>
    %13 = arith.addf %9, %12 : vector<16x32xf32>
    %14 = vector.extract_strided_slice %3 {offsets = [2, 0], sizes = [16, 32], strides = [1, 1]} : vector<20x32xf32> to vector<16x32xf32>
    %15 = vector.extract_strided_slice %4 {offsets = [64, 0], sizes = [32, 32], strides = [1, 1]} : vector<160x32xf32> to vector<32x32xf32>
    %cst_8 = arith.constant dense<0.000000e+00> : vector<16x32xf32>
    %16 = tpu.matmul %14, %15, %cst_8 {dimension_numbers = #tpu.dot_dimension_numbers<[1], [0], [0], [1], [0, 0, 1, 1], [], []>} : vector<16x32xf32>, vector<32x32xf32>, vector<16x32xf32> -> vector<16x32xf32>
    %17 = arith.addf %13, %16 : vector<16x32xf32>
    %18 = vector.extract_strided_slice %3 {offsets = [3, 0], sizes = [16, 32], strides = [1, 1]} : vector<20x32xf32> to vector<16x32xf32>
    %19 = vector.extract_strided_slice %4 {offsets = [96, 0], sizes = [32, 32], strides = [1, 1]} : vector<160x32xf32> to vector<32x32xf32>
    %cst_9 = arith.constant dense<0.000000e+00> : vector<16x32xf32>
    %20 = tpu.matmul %18, %19, %cst_9 {dimension_numbers = #tpu.dot_dimension_numbers<[1], [0], [0], [1], [0, 0, 1, 1], [], []>} : vector<16x32xf32>, vector<32x32xf32>, vector<16x32xf32> -> vector<16x32xf32>
    %21 = arith.addf %17, %20 : vector<16x32xf32>
    %22 = vector.extract_strided_slice %3 {offsets = [4, 0], sizes = [16, 32], strides = [1, 1]} : vector<20x32xf32> to vector<16x32xf32>
    %23 = vector.extract_strided_slice %4 {offsets = [128, 0], sizes = [32, 32], strides = [1, 1]} : vector<160x32xf32> to vector<32x32xf32>
    %cst_10 = arith.constant dense<0.000000e+00> : vector<16x32xf32>
    %24 = tpu.matmul %22, %23, %cst_10 {dimension_numbers = #tpu.dot_dimension_numbers<[1], [0], [0], [1], [0, 0, 1, 1], [], []>} : vector<16x32xf32>, vector<32x32xf32>, vector<16x32xf32> -> vector<16x32xf32>
    %25 = arith.addf %21, %24 : vector<16x32xf32>
    %26 = vector.shape_cast %6 : vector<32xf32> to vector<1x32xf32>
    %27 = vector.broadcast %26 : vector<1x32xf32> to vector<16x32xf32>
    %28 = arith.addf %25, %27 : vector<16x32xf32>
    %cst_11 = arith.constant 5.000000e-01 : f32
    %29 = vector.broadcast %cst_11 : f32 to vector<16x32xf32>
    %30 = arith.mulf %29, %28 : vector<16x32xf32>
    %cst_12 = arith.constant 0.707106769 : f32
    %31 = vector.broadcast %cst_12 : f32 to vector<16x32xf32>
    %32 = arith.mulf %28, %31 : vector<16x32xf32>
    %33 = math.erf %32 : vector<16x32xf32>
    %cst_13 = arith.constant 1.000000e+00 : f32
    %34 = vector.broadcast %cst_13 : f32 to vector<16x32xf32>
    %35 = arith.addf %34, %33 : vector<16x32xf32>
    %36 = arith.mulf %30, %35 : vector<16x32xf32>
    %37 = arith.addf %1, %36 : vector<16x32xf32>
    %cst_14 = arith.constant dense<0.000000e+00> : vector<16xf32>
    %38 = vector.multi_reduction <add>, %37, %cst_14 [1] : vector<16x32xf32> to vector<16xf32>
    %39 = vector.shape_cast %38 : vector<16xf32> to vector<16x1xf32>
    %cst_15 = arith.constant 3.200000e+01 : f32
    %40 = vector.broadcast %cst_15 : f32 to vector<16x1xf32>
    %41 = arith.divf %39, %40 : vector<16x1xf32>
    %42 = arith.mulf %37, %37 : vector<16x32xf32>
    %cst_16 = arith.constant dense<0.000000e+00> : vector<16xf32>
    %43 = vector.multi_reduction <add>, %42, %cst_16 [1] : vector<16x32xf32> to vector<16xf32>
    %44 = vector.shape_cast %43 : vector<16xf32> to vector<16x1xf32>
    %cst_17 = arith.constant 3.200000e+01 : f32
    %45 = vector.broadcast %cst_17 : f32 to vector<16x1xf32>
    %46 = arith.divf %44, %45 : vector<16x1xf32>
    %47 = arith.mulf %41, %41 : vector<16x1xf32>
    %48 = arith.subf %46, %47 : vector<16x1xf32>
    %49 = vector.broadcast %41 : vector<16x1xf32> to vector<16x32xf32>
    %50 = arith.subf %37, %49 : vector<16x32xf32>
    %cst_18 = arith.constant 9.99999974E-6 : f32
    %51 = vector.broadcast %cst_18 : f32 to vector<16x1xf32>
    %52 = arith.addf %48, %51 : vector<16x1xf32>
    %53 = math.rsqrt %52 : vector<16x1xf32>
    %54 = vector.broadcast %53 : vector<16x1xf32> to vector<16x32xf32>
    %55 = arith.mulf %50, %54 : vector<16x32xf32>
    %c0_19 = arith.constant 0 : index
    %c0_20 = arith.constant 0 : index
    %c0_21 = arith.constant 0 : index
    %56 = vector.load %arg5[%c0_19, %c0_20, %c0_21] : memref<1x16x32xf32, #tpu.memory_space<vmem>>, vector<1x16x32xf32>
    %57 = vector.shape_cast %56 : vector<1x16x32xf32> to vector<16x32xf32>
    %58 = vector.shape_cast %55 : vector<16x32xf32> to vector<1x16x32xf32>
    tpu.vector_store %arg5[%c0_19, %c0_20, %c0_21], %58 {strides = array<i32>} : memref<1x16x32xf32, #tpu.memory_space<vmem>>, vector<1x16x32xf32>,
    return
  }
  func.func @transform_0(%arg0: i32, %arg1: i32) -> (i32, i32, i32) {
    %c0_i32 = arith.constant 0 : i32
    %c0_i32_0 = arith.constant 0 : i32
    return %arg0, %arg1, %c0_i32 : i32, i32, i32
  }
  func.func @transform_1(%arg0: i32, %arg1: i32) -> (i32, i32) {
    %c0_i32 = arith.constant 0 : i32
    %c0_i32_0 = arith.constant 0 : i32
    %c0_i32_1 = arith.constant 0 : i32
    return %c0_i32, %c0_i32_0 : i32, i32
  }
  func.func @transform_2(%arg0: i32, %arg1: i32) -> (i32, i32) {
    %c0_i32 = arith.constant 0 : i32
    %c0_i32_0 = arith.constant 0 : i32
    %c0_i32_1 = arith.constant 0 : i32
    return %c0_i32, %c0_i32_0 : i32, i32
  }
  func.func @transform_3(%arg0: i32, %arg1: i32) -> (i32, i32, i32) {
    %c0_i32 = arith.constant 0 : i32
    %c0_i32_0 = arith.constant 0 : i32
    return %arg0, %arg1, %c0_i32 : i32, i32, i32
  }
}

</mosaic_0001>

<bundles_post_ra>
// kernel: tpu_custom_call.1
= control target key start
LH: loop header
LB: loop body
LE: loop exit
PB: predicated region body
PF: predicated region fallthrough
CT: control target
= control target key end

     0   :  { %8 = vsyncpa [#allocation3], 0  ;;  %s1344_s0 = inlined_call_operand.vmem [shape: f32[2,16,32], index: 0, kind: input, shape index: {}]   ;;  %s1345_s1 = inlined_call_operand.vmem [shape: f32[160,32], index: 1, kind: input, shape index: {}]   ;;  %s1346_s2 = inlined_call_operand.vmem [shape: f32[1,32], index: 2, kind: input, shape index: {}]   ;;  %s1347_s3 = inlined_call_operand.hbm [shape: f32[2,16,32], index: 3, kind: output, shape index: {}]  }
   0x1   :  { %10 = vsyncpa [#allocation3 + $0x1], 0  ;;  %s1136_s12 = smov 0   ;;  %s1138_s13 = smov 0  }
   0x2   :  { %s1140_s14 = smov 0   ;;  %s1142_s15 = smov 0  }
   0x3   :  { %s1144_s16 = smov 0   ;;  %s1146_s17 = smov 0  }
   0x4 LB: > { %s809_s18 = sadd.s32 4294967295, %s1111_s17   ;;  %s810_s19 = sadd.s32 4294967294, %s1111_s17   ;;  %s1111_s17 = sphi %s1146_s17, %s16_s17   ;;  %s1107_s16 = sphi %s1144_s16, %s1354_s16   ;;  %s1103_s15 = sphi %s1142_s15, %s1353_s15   ;;  %s1099_s14 = sphi %s1140_s14, %s1352_s14   ;;  %s1095_s13 = sphi %s1138_s13, %s1351_s13   ;;  %s1091_s12 = sphi %s1136_s12, %s1350_s12  }
   0x5   : > { %s28_s20 = sadd.s32 1, %s1107_s16  ;;  %s107_s21 = sadd.s32 1, %s1099_s14 }
   0x6   : > { %p30_p0 = scmp.ge.s32.totalorder %s28_s20, 2  ;;  %p117_p1 = scmp.ne.s32.totalorder %s1099_s14, %s1095_s13 }
   0x7   : > { %p118_p2 = scmp.eq.s32.totalorder %s809_s18, 1  ;;  %p123_p3 = scmp.ne.s32.totalorder %s1095_s13, %s1091_s12 }
   0x8   : > { %s1356_s20 = smov (%p30_p0, %s28_s20), 0  ;;  %p124_p5 = scmp.eq.s32.totalorder %s810_s19, 1 }
   0x9   : > { %p1176_p4 = por %p118_p2, %p117_p1  ;;  %s102_s23 = ssub.s32 %s1107_s16, %s1356_s20 }
   0xa   : > { %p813_p6 = scmp.ge.s32.totalorder %s1111_s17, 1  ;;  %p105_p7 = scmp.eq.s32.totalorder %s102_s23, 0 }
   0xb   : > { %p1183_p8 = por %p124_p5, %p123_p3  ;;  %p161_p9 = scmp.lt.s32.totalorder %s1111_s17, 3 }
   0xc   : > { %s1189_s25 = scalar_select %p105_p7, %s1099_s14, %s107_s21  }
   0xd   : > { %p162_p10 = pnand %p813_p6, %p161_p9 }
   0xe   : > { %v220_v0 = vld [vmem:[%s1345_s1 + $0x40] sm:$0xff] (!%p162_p10)  ;;  %v221_v1 = vld [vmem:[%s1345_s1 + $0x48] sm:$0xff] (!%p162_p10)  ;;  %p190_p11 = scmp.lt.s32.totalorder (!%p162_p10), %s1103_s15, 1  ;;  %v222_v5 = vld [vmem:[%s1345_s1 + $0x50] sm:$0xff] (!%p162_p10)  ;;  %vm204_vm0 = vcmask (!%p162_p10), 1041408   ;;  %vm235_vm1 = vcmask (!%p162_p10), 1046528  }
   0xf   : > { %165 = sbr.rel (%p162_p10) target bundleno = 469 (0x1d5), region = 32  ;;  %v216_v2 = vld [vmem:[%s1345_s1 + $0x20] sm:$0xff] (!%p162_p10)  ;;  %v936_v3 = vpack.c.bf16 (!%p162_p10), %v221_v1, %v220_v0  ;;  %v217_v4 = vld [vmem:[%s1345_s1 + $0x28] sm:$0xff] (!%p162_p10)  ;;  %v223_v6 = vld [vmem:[%s1345_s1 + $0x58] sm:$0xff] (!%p162_p10)  ;;  %vm241_vm2 = vcmask (!%p162_p10), 261120   ;;  %vm400_vm3 = vcmask (!%p162_p10), 1045504  }
  0x10   : > { %v920_v7 = vpack.c.bf16 (!%p162_p10), %v217_v4, %v216_v2  ;;  %v940_v8 = vpack.c.bf16 (!%p162_p10), %v223_v6, %v222_v5  ;;  %v218_v9 = vld [vmem:[%s1345_s1 + $0x30] sm:$0xff] (!%p162_p10)  ;;  %v219_v10 = vld [vmem:[%s1345_s1 + $0x38] sm:$0xff] (!%p162_p10)  ;;  %v224_v11 = vld [vmem:[%s1345_s1 + $0x60] sm:$0xff] (!%p162_p10)  ;;  %vm487_vm4 = vcmask (!%p162_p10), 1044480   ;;  %vm574_vm5 = vcmask (!%p162_p10), 1043456   ;;  %s186_s18 = sand.u32 (!%p162_p10), 1, %s1095_s13  }
  0x11   : > { %937 = vmatprep.subr.bf16.mxu0 (!%p162_p10), %v936_v3  ;;  %v924_v12 = vpack.c.bf16 (!%p162_p10), %v219_v10, %v218_v9  ;;  %v225_v13 = vld [vmem:[%s1345_s1 + $0x68] sm:$0xff] (!%p162_p10)  ;;  %v212_v14 = vld [vmem:[%s1345_s1] sm:$0xff] (!%p162_p10)  ;;  %v226_v22 = vld [vmem:[%s1345_s1 + $0x70] sm:$0xff] (!%p162_p10)  ;;  %s814_s19 = sshll.u32 (!%p162_p10), %s186_s18, 4  ;;  %s834_s21 = sshll.u32 (!%p162_p10), %s1103_s15, 8 }
  0x12   : > { %v213_v15 = vld [vmem:[%s1345_s1 + $0x8] sm:$0xff] (!%p162_p10)  ;;  %921 = vmatprep.subr.bf16.mxu1 (!%p162_p10), %v920_v7  ;;  %939 = vmatpush3.bf16.msra.mxu0 (!%p162_p10), %v936_v3  ;;  %v944_v16 = vpack.c.bf16 (!%p162_p10), %v225_v13, %v224_v11  ;;  %v227_v26 = vld [vmem:[%s1345_s1 + $0x78] sm:$0xff] (!%p162_p10)  ;;  %v214_v27 = vld [vmem:[%s1345_s1 + $0x10] sm:$0xff] (!%p162_p10)  ;;  %s1293_s29 = scalar_lea.hbm (!%p162_p10), %s1347_s3, %s834_s21  ;;  %s1113_s4 = smov (!%p162_p10), [#allocation2]  }
  0x13   : > { %923 = vmatpush3.bf16.msra.mxu1 (!%p162_p10), %v920_v7  ;;  %941 = vmatprep.subr.bf16.mxu0 (!%p162_p10), %v940_v8  ;;  %v928_v19 = vpack.c.bf16 (!%p162_p10), %v213_v15, %v212_v14  ;;  %v215_v28 = vld [vmem:[%s1345_s1 + $0x18] sm:$0xff] (!%p162_p10)  ;;  %v948_v39 = vpack.c.bf16 (!%p162_p10), %v227_v26, %v226_v22  ;;  %v228_v43 = vld [vmem:[%s1345_s1 + $0x80] sm:$0xff] (!%p162_p10)  ;;  %v229_v44 = vld [vmem:[%s1345_s1 + $0x88] sm:$0xff] (!%p162_p10)  ;;  %s1037_s5 = sshll.u32 (!%p162_p10), %s1113_s4, 4  ;;  %s1038_s5 = int_to_ptr.vmem [resolvable:$false] %s1037_s5 }
  0x14   : > { %925 = vmatprep.subr.bf16.mxu1 (!%p162_p10), %v924_v12  ;;  %v932_v40 = vpack.c.bf16 (!%p162_p10), %v215_v28, %v214_v27  ;;  %v952_v47 = vpack.c.bf16 (!%p162_p10), %v229_v44, %v228_v43  ;;  %v230_v50 = vld [vmem:[%s1345_s1 + $0x90] sm:$0xff] (!%p162_p10)  ;;  %v231_v51 = vld [vmem:[%s1345_s1 + $0x98] sm:$0xff] (!%p162_p10)  ;;  %v827_v59 = vld [vmem:[%s1346_s2] ss:$0 sm:$0xff] (!%p162_p10)  ;;  %s1039_s6 = scalar_lea.vmem (!%p162_p10), %s1038_s5, 512 }
  0x15   : > { %v956_v53 = vpack.c.bf16 (!%p162_p10), %v231_v51, %v230_v50 }
  0x16   : > { %s191_s23 = scalar_select %p190_p11, %s1103_s15, 1  ;;  %943 = vmatpush3.bf16.msra.mxu0 %v940_v8 }
  0x17   : > { %927 = vmatpush3.bf16.msra.mxu1 %v924_v12  ;;  %945 = vmatprep.subr.bf16.mxu0 %v944_v16  ;;  %s1298_s15 = scalar_lea.sflag [#allocation3], %s186_s18 }
  0x18   : > { %s833_s7 = sshll.u32 %s191_s23, 4  ;;  %929 = vmatprep.subr.bf16.mxu1 %v928_v19  ;;  %s188_s23 = scalar_lea.vmem [#allocation2], %s814_s19 }
  0x19   : > { %s197_s10 = scalar_lea.vmem %s1344_s0, %s833_s7  ;;  %s730_s26 = sshll.u32 %s188_s23, 4  ;;  %s1295_s26 = int_to_ptr.vmem [resolvable:$true] %s730_s26 }
  0x1a   : > { %v1232_v17 = vld [vmem:[%s197_s10] sm:$0xff]  ;;  %v1234_v18 = vld [vmem:[%s197_s10 + $0x8] sm:$0xff]  ;;  %s1033_s30 = scalar_lea.vmem %s1295_s26, 256  ;;  %p1040_p1 = scmp.lt.s32.totalorder %s1295_s26, %s1038_s5 }
  0x1b   : > { %v205_v20 = vrot.slane %v1232_v17, 6  ;;  %v206_v21 = vrot.slane %v1234_v18, 6  ;;  %p1034_p12 = scmp.ne.s32.totalorder %s1295_s26, %s1033_s30  ;;  %p1041_p2 = scmp.lt.s32.totalorder %s1039_s6, %s1033_s30 }
  0x1d   : > { %v207_v23 = vsel %vm204_vm0, %v205_v20, %v206_v21  ;;  %v210_v24 = vsel %vm204_vm0, 0.0, %v205_v20  ;;  %v211_v25 = vsel %vm204_vm0, %v206_v21, 0.0  ;;  %p1035_p13 = pnand %p1034_p12, %p1176_p4  ;;  %p1042_p3 = por %p1041_p2, %p1040_p1 }
  0x1e   : > { %v236_v29 = vrot.slane %v210_v24, 1  ;;  %v237_v30 = vrot.slane %v207_v23, 1  ;;  %v401_v31 = vrot.slane %v210_v24, 2  ;;  %v402_v32 = vrot.slane %v207_v23, 2 }
  0x1f   : > { %v239_v33 = vrot.slane %v211_v25, 1  ;;  %v404_v34 = vrot.slane %v211_v25, 2  ;;  %v488_v35 = vrot.slane %v210_v24, 3  ;;  %v489_v36 = vrot.slane %v207_v23, 3  ;;  %p1036_p0 = pneg %p1035_p13 }
  0x20   : > { %v238_v37 = vsel %vm235_vm1, %v236_v29, %v237_v30  ;;  %v403_v38 = vsel %vm400_vm3, %v401_v31, %v402_v32  ;;  %v491_v46 = vrot.slane %v211_v25, 3  ;;  %v575_v48 = vrot.slane %v210_v24, 4 }
  0x21   : > { %873 = vmatprep.mubr.msk.f32.mxu1 %vm241_vm2, %v238_v37  ;;  %895 = vmatprep.mubr.msk.f32.mxu0 %vm241_vm2, %v403_v38  ;;  %v240_v41 = vsel %vm235_vm1, %v237_v30, %v239_v33  ;;  %v405_v42 = vsel %vm400_vm3, %v402_v32, %v404_v34  ;;  %v490_v45 = vsel %vm487_vm4, %v488_v35, %v489_v36  ;;  %v576_v49 = vrot.slane %v207_v23, 4  ;;  %p1043_p5 = pnand %p1042_p3, %p1036_p0 }
  0x22   : > { %874 = vmatmul.mubr.msk.f32.vlgmr.msra.gmra.mrb[0].mxu1 %vm241_vm2, %v240_v41  ;;  %896 = vmatmul.mubr.msk.f32.vlgmr.msra.gmra.mrb[0].mxu0 %vm241_vm2, %v405_v42  ;;  %v492_v52 = vsel %vm487_vm4, %v489_v36, %v491_v46  ;;  %v578_v55 = vrot.slane %v211_v25, 4 }
  0x23   : > { %947 = vmatpush3.bf16.msra.mxu0 %v944_v16  ;;  %931 = vmatpush3.bf16.msra.mxu1 %v928_v19  ;;  %v577_v54 = vsel %vm574_vm5, %v575_v48, %v576_v49 }
  0x24   : > { %949 = vmatprep.subr.bf16.mxu0 %v948_v39  ;;  %933 = vmatprep.subr.bf16.mxu1 %v932_v40  ;;  %v579_v56 = vsel %vm574_vm5, %v576_v49, %v578_v55 }
  0x25   : > { %884 = vmatprep.mubr.msk.f32.mxu1 %vm241_vm2, %v210_v24  ;;  %906 = vmatprep.mubr.msk.f32.mxu0 %vm241_vm2, %v490_v45 }
  0x27   : > { %951 = vmatpush3.bf16.msra.mxu0 %v948_v39  ;;  %935 = vmatpush3.bf16.msra.mxu1 %v932_v40 }
  0x28   : > { %953 = vmatprep.subr.bf16.mxu0 %v952_v47 }
  0x2a   : > { %885 = vmatmul.mubr.msk.f32.vlgmr.msra.gmra.mrb[0].mxu1 %vm241_vm2, %v207_v23  ;;  %907 = vmatmul.mubr.msk.f32.vlgmr.msra.gmra.mrb[0].mxu0 %vm241_vm2, %v492_v52 }
  0x2b   : > { %955 = vmatpush3.bf16.msra.mxu0 %v952_v47  ;;  %917 = vmatprep.mubr.msk.f32.mxu0 %vm241_vm2, %v577_v54 }
  0x2c   : > { %957 = vmatprep.subr.bf16.mxu0 %v956_v53 }
  0x2f   : > { %959 = vmatpush3.bf16.msra.mxu0 %v956_v53 }
  0x32   : > { %918 = vmatmul.mubr.msk.f32.vlgmr.msra.gmra.mrb[0].mxu0 %vm241_vm2, %v579_v56 }
  0xfd   : > { %v886_v57 = vpop.f32.mrb[0].mxu1 }
  0xfe   : > { %v391_v58 = vpop.f32.mrb[1].mxu1 }
 0x105   : > { %v919_v60 = vpop.f32.mrb[0].mxu0 }
 0x106   : > { %v960_v61 = vadd.f32 %v919_v60, %v886_v57  ;;  %v650_v62 = vpop.f32.mrb[1].mxu0 }
 0x107   : > { %v961_v63 = vadd.f32 %v650_v62, %v391_v58 }
 0x108   : > { %v668_v0 = vadd.f32 %v960_v61, %v827_v59 }
 0x109   : > { %v667_v1 = vadd.f32 %v961_v63, %v827_v59 }
 0x10a   : > { %v672_v2 = vmul.f32 0.70710677, %v668_v0  ;;  %v670_v6 = vmul.f32 0.5, %v668_v0 }
 0x10b   : > { %v671_v3 = vmul.f32 0.70710677, %v667_v1  ;;  %v669_v8 = vmul.f32 0.5, %v667_v1 }
 0x10c   : > { %1025 = verf.f32 %v672_v2 }
 0x10d   : > { %1027 = verf.f32 %v671_v3 }
 0x116   : > { %v1026_v4 = vpop.eup %1025 }
 0x117   : > { %v1028_v5 = vpop.eup %1027  ;;  %v676_v7 = vadd.f32 1.0, %v1026_v4 }
 0x118   : > { %v675_v9 = vadd.f32 1.0, %v1028_v5 }
 0x119   : > { %v678_v10 = vmul.f32 %v676_v7, %v670_v6 }
 0x11a   : > { %v677_v11 = vmul.f32 %v675_v9, %v669_v8 }
 0x11b   : > { %v680_v13 = vadd.f32 %v678_v10, %v1234_v18 }
 0x11c   : > { %v679_v12 = vadd.f32 %v677_v11, %v1232_v17 }
 0x11d   : > { %v691_v19 = vmul.f32 %v680_v13, %v680_v13  ;;  %v684_v20 = vsel %vm241_vm2, %v680_v13, 0.0 }
 0x11e   : > { %v681_v14 = vsel %vm241_vm2, %v679_v12, 0.0  ;;  %v690_v15 = vmul.f32 %v679_v12, %v679_v12 }
 0x11f   : > { %682 = vadd.xlane.f32.xlu0 %v681_v14  ;;  %v695_v21 = vsel %vm241_vm2, %v691_v19, 0.0 }
 0x120   : > { %v692_v16 = vsel %vm241_vm2, %v690_v15, 0.0 }
 0x121   : > { %693 = vadd.xlane.f32.xlu1 %v692_v16 }
 0x123   : > { %685 = vadd.xlane.f32.xlu0 %v684_v20 }
 0x125   : > { %696 = vadd.xlane.f32.xlu1 %v695_v21 }
 0x1ac   : > { %v683_v22 = vpop.xlane.xlu0 %682 }
 0x1ad   : > { %v688_v23 = vmul.f32 0.03125, %v683_v22 }
 0x1ae   : > { %v694_v17 = vpop.xlane.xlu1 %693 }
 0x1af   : > { %v700_v24 = vmul.f32 %v688_v23, %v688_v23  ;;  %v698_v18 = vmul.f32 0.03125, %v694_v17  ;;  %v704_v34 = vsub.f32 %v679_v12, %v688_v23 }
 0x1b0   : > { %v686_v25 = vpop.xlane.xlu0 %685 }
 0x1b1   : > { %v702_v26 = vsub.f32 %v698_v18, %v700_v24  ;;  %v689_v27 = vmul.f32 0.03125, %v686_v25 }
 0x1b2   : > { %v697_v28 = vpop.xlane.xlu1 %696 }
 0x1b3   : > { %v706_v29 = vadd.f32 1e-05, %v702_v26  ;;  %v701_v30 = vmul.f32 %v689_v27, %v689_v27  ;;  %v699_v31 = vmul.f32 0.03125, %v697_v28  ;;  %v705_v37 = vsub.f32 %v680_v13, %v689_v27 }
 0x1b5   : > { %1029 = vrsqrt.f32 %v706_v29  ;;  %v703_v32 = vsub.f32 %v699_v31, %v701_v30 }
 0x1b7   : > { %v707_v33 = vadd.f32 1e-05, %v703_v32 }
 0x1b9   : > { %1031 = vrsqrt.f32 %v707_v33 }
 0x1bf   : > { %v1030_v35 = vpop.eup %1029 }
 0x1c0   : > { %v710_v36 = vmul.f32 %v1030_v35, %v704_v34 }
 0x1c2   : > { %712 = vst.msk [vmem:[%s188_s23] sm:$0xff] %vm241_vm2, %v710_v36 }
 0x1c3   : > { %v1032_v38 = vpop.eup %1031 }
 0x1c4   : > { %v711_v39 = vmul.f32 %v1032_v38, %v705_v37 }
 0x1c6   : > { %713 = vst.msk [vmem:[%s188_s23 + $0x8] sm:$0xff] %vm241_vm2, %v711_v39 }
 0x1c7   : > { %1046 = shalt.err (!%p1043_p5)
}
 0x1c8   : > { %s1047_s7 = scalar_lea.hbm %s1293_s29, 256  ;;  %s1051_s10 = scalar_lea.hbm %s1347_s3, 512 }
 0x1c9   : > { %p1048_p6 = scmp.ne.s32.totalorder %s1293_s29, %s1047_s7  ;;  %p1052_p10 = scmp.lt.u32.totalorder %s1293_s29, %s1347_s3 }
 0x1ca   : > { %p1053_p11 = scmp.lt.u32.totalorder %s1051_s10, %s1047_s7  ;;  %p1055_p13 = scmp.lt.u32.totalorder %s1047_s7, %s1293_s29 }
 0x1cb   : > { %p1049_p7 = pnand %p1048_p6, %p1176_p4 }
 0x1cc   : > { %p1054_p12 = por %p1053_p11, %p1052_p10 }
 0x1cd   : > { %p1050_p9 = pneg %p1049_p7 }
 0x1ce   : > { %p1056_p0 = por %p1055_p13, %p1054_p12 }
 0x1d0   : > { %p1057_p1 = pnand %p1056_p0, %p1050_p9 }
 0x1d2   : > { %1060 = shalt.err (!%p1057_p1)
}
 0x1d3   : > { %s1114_s19 = smov 128   ;;  %s1115_s21 = smov 8  }
 0x1d4   : > { %968 = dma.vmem_to_hbm [thread:$0]  (%p1176_p4), %s1295_s26, 256, %s1293_s29, %s1298_s15, %s1114_s19, %s1114_s19, %s1115_s21  }
 0x1d5 PF: > { %p974_p2 = scmp.ge.s32.totalorder %s1111_s17, 2  ;;  %s745_s23 = sand.u32 1, %s1091_s12  }
 0x1d6   : > { %s746_s27 = scalar_lea.sflag [#allocation3], %s745_s23 }
 0x1d7   : > { %p971_p3 = pnand %p974_p2, %p1183_p8 }
 0x1d9   : > { %1086 = dma.done.wait (!%p971_p3), %s746_s27, 256  }
 0x1da   : > { %1088 = vsyncadd (!%p971_p3), %s746_s27, 4294967040  ;;  %s16_s17 = sadd.s32 1, %s1111_s17   ;;  %s1350_s12 = smov %s1095_s13 }
 0x1db   : > { %p13_p5 = scmp.ge.s32.totalorder %s16_s17, 4   ;;  %s1351_s13 = smov %s1099_s14 }
 0x1dc   : > { %s1352_s14 = smov %s1189_s25  ;;  %s1353_s15 = smov %s1107_s16 }
 0x1dd   : > { %s1354_s16 = smov %s1356_s20  ;;  %15 = sbr.rel (!%p13_p5) target bundleno = 4 (0x4), region = 67 }
 0x1e4   :  { %751 = vsyncpa [#allocation3], 1 }
 0x1e5   :  { %753 = vsyncpa [#allocation3 + $0x1], 1 }

</bundles_post_ra>
